<compile_context>
chip_gen: v7x
topology: tpu7x:2x2x1
jax: 0.10.0
libtpu: 0.0.40
codegen_flags: <defaults>
</compile_context>

<pallas_src>
import functools
import numpy as np
import jax
import jax.numpy as jnp
from jax.experimental import pallas as pl
from jax.experimental.pallas import tpu as pltpu


def _round_up(x: int, m: int) -> int:
    return ((x + m - 1) // m) * m


# ----------------------------- kernel -----------------------------------------
def _layernorm_kernel(params_ref, x_ref, o_ref, *, eps: float, d: int):
    # params_ref: SMEM (2,) = [alpha, gamma];  x_ref / o_ref: (TR, D) VMEM tiles.
    x = x_ref[...].astype(jnp.float32)                  # single upcast per tile
    alpha = params_ref[0]
    gamma = params_ref[1]

    # Single-pass moments: the two lane reductions are independent -> overlap on XLU.
    s = jnp.sum(x, axis=-1, keepdims=True)              # (TR, 1)
    sq = jnp.sum(x * x, axis=-1, keepdims=True)         # (TR, 1)
    mean = s * (1.0 / d)
    # torch.Tensor.std is unbiased by default -> divide by (D - 1).
    var = (sq - s * mean) * (1.0 / max(d - 1, 1))
    var = jnp.maximum(var, 0.0)                          # guard f32 cancellation
    inv = 1.0 / (jnp.sqrt(var) + eps)                    # exact; (TR,1) column only
    scale = alpha * inv                                  # fold alpha into per-row scale
    o_ref[...] = (scale * (x - mean) + gamma).astype(o_ref.dtype)


# ----------------------------- tiling ------------------------------------------
def _pick_row_tile(rows: int, d: int, itemsize: int, *,
                   tile_bytes_target: int = 2 << 20, min_grid_steps: int = 8) -> int:
    """Rows per grid step: ~tile_bytes_target of input per step, several steps total."""
    # Packed-sublane multiple: 8 for f32, 16 for bf16, 32 for int8/fp8.
    sub = max(8, 32 // max(1, itemsize))
    tr = max(sub, tile_bytes_target // max(1, d * itemsize))
    # Keep >= min_grid_steps steps so the "parallel" axis shards across v7x's 2 TCs.
    tr = min(tr, max(sub, -(-rows // min_grid_steps)))
    tr = max(sub, (tr // sub) * sub)
    tr = min(tr, _round_up(rows, sub))
    return int(tr)


# ----------------------------- wrapper -----------------------------------------
def layernorm_forward(x, alpha, gamma, *, eps: float = 1e-5, row_tile: int | None = None):
    """x: (..., D). alpha/gamma: python/0-d scalars (module params, init 1 and 0)."""
    orig_shape = x.shape
    D = int(orig_shape[-1])
    R = int(np.prod(orig_shape[:-1])) if len(orig_shape) > 1 else 1
    x2 = x.reshape(R, D)

    in_itemsize = jnp.dtype(x.dtype).itemsize
    out_itemsize = in_itemsize
    if row_tile is None:
        TR = _pick_row_tile(R, D, in_itemsize)
    else:
        sub = max(8, 32 // in_itemsize)
        TR = max(sub, (int(row_tile) // sub) * sub)

    grid = (pl.cdiv(R, TR),)                              # ragged last block is masked

    # VMEM accounting: double-buffered in + out tiles plus the f32 upcast / centered
    # intermediates (~2 * TR * D * 4 B) that live inside the kernel body.
    tile_elems = TR * D
    vmem_need = tile_elems * (2 * in_itemsize + 2 * out_itemsize + 2 * 4)
    vmem_limit = int(min(max(vmem_need + (8 << 20), 16 << 20), 48 << 20))  # v7x-safe cap

    params = jnp.asarray([alpha, gamma], dtype=jnp.float32)
    kernel = functools.partial(_layernorm_kernel, eps=float(eps), d=D)

    cost = pl.CostEstimate(
        flops=7 * R * D,
        transcendentals=R,                        # one sqrt per row
        bytes_accessed=2 * R * D * in_itemsize,   # read x + write out (mem-bound)
    )

    out = pl.pallas_call(
        kernel,
        out_shape=jax.ShapeDtypeStruct((R, D), x.dtype),
        grid_spec=pltpu.PrefetchScalarGridSpec(
            num_scalar_prefetch=1,                # [alpha, gamma] -> SMEM
            grid=grid,
            in_specs=[pl.BlockSpec((TR, D), lambda i, _p: (i, 0))],
            out_specs=pl.BlockSpec((TR, D), lambda i, _p: (i, 0)),
        ),
        compiler_params=pltpu.CompilerParams(
            dimension_semantics=("parallel",),    # both TCs on v7x; no-op v5e/v6e
            vmem_limit_bytes=vmem_limit,
        ),
        cost_estimate=cost,
    )(params, x2)

    return out.reshape(orig_shape)


# ----------------------------- demo / check -----------------------------------
if __name__ == "__main__":
    # Small shapes consistent with the module: batch=4, seq=33, hidden=128.
    # (hidden lane-dense; seq=33 makes R=132, exercising the ragged last block.)
    B, S, D = 4, 33, 128
    eps = 1e-5

    key = jax.random.PRNGKey(0)
    x = jax.random.normal(key, (B, S, D), dtype=jnp.float32)

    # Module initializes alpha=1, gamma=0; use non-trivial values to exercise the
    # affine part of the kernel too.
    alpha, gamma = 1.5, 0.25

    out = layernorm_forward(x, alpha, gamma, eps=eps)
    out = jax.block_until_ready(out)

    # Pure-JAX reference of the PyTorch forward (torch.std is unbiased -> ddof=1).
    mean = x.mean(-1, keepdims=True)
    std = jnp.std(x, axis=-1, keepdims=True, ddof=1)
    ref = alpha * (x - mean) / (std + eps) + gamma

    np.testing.assert_allclose(np.asarray(out), np.asarray(ref), rtol=1e-5, atol=1e-5)
    print("KERNEL_OK")
</pallas_src>

<mosaic_0001>
module attributes {stable_mosaic.version = 11 : i64} {
  func.func @_layernorm_kernel(%arg0: i32, %arg1: memref<2xf32, #tpu.memory_space<smem>>, %arg2: memref<16x128xf32, #tpu.memory_space<vmem>>, %arg3: memref<16x128xf32, #tpu.memory_space<vmem>>) attributes {dimension_semantics = [#tpu.dimension_semantics<parallel>], iteration_bounds = array<i64: 9>, scalar_prefetch = 1 : i64, scratch_operands = 0 : i64, tpu.core_type = #tpu.core_type<tc>, window_params = [{transform_indices = @transform_0, window_bounds = array<i64: 16, 128>}, {transform_indices = @transform_1, window_bounds = array<i64: 16, 128>}]} {
    %c0 = arith.constant 0 : index
    %c0_0 = arith.constant 0 : index
    %0 = vector.load %arg2[%c0, %c0_0] : memref<16x128xf32, #tpu.memory_space<vmem>>, vector<16x128xf32>
    %c0_1 = arith.constant 0 : index
    %1 = memref.load %arg1[%c0_1] : memref<2xf32, #tpu.memory_space<smem>>
    %c1 = arith.constant 1 : index
    %2 = memref.load %arg1[%c1] : memref<2xf32, #tpu.memory_space<smem>>
    %cst = arith.constant dense<0.000000e+00> : vector<16xf32>
    %3 = vector.multi_reduction <add>, %0, %cst [1] : vector<16x128xf32> to vector<16xf32>
    %4 = vector.shape_cast %3 : vector<16xf32> to vector<16x1xf32>
    %5 = arith.mulf %0, %0 : vector<16x128xf32>
    %cst_2 = arith.constant dense<0.000000e+00> : vector<16xf32>
    %6 = vector.multi_reduction <add>, %5, %cst_2 [1] : vector<16x128xf32> to vector<16xf32>
    %7 = vector.shape_cast %6 : vector<16xf32> to vector<16x1xf32>
    %cst_3 = arith.constant 7.812500e-03 : f32
    %8 = vector.broadcast %cst_3 : f32 to vector<16x1xf32>
    %9 = arith.mulf %4, %8 : vector<16x1xf32>
    %10 = arith.mulf %4, %9 : vector<16x1xf32>
    %11 = arith.subf %7, %10 : vector<16x1xf32>
    %cst_4 = arith.constant 0.00787401571 : f32
    %12 = vector.broadcast %cst_4 : f32 to vector<16x1xf32>
    %13 = arith.mulf %11, %12 : vector<16x1xf32>
    %cst_5 = arith.constant 0.000000e+00 : f32
    %14 = vector.broadcast %cst_5 : f32 to vector<16x1xf32>
    %15 = arith.maximumf %13, %14 : vector<16x1xf32>
    %16 = math.sqrt %15 : vector<16x1xf32>
    %cst_6 = arith.constant 9.99999974E-6 : f32
    %17 = vector.broadcast %cst_6 : f32 to vector<16x1xf32>
    %18 = arith.addf %16, %17 : vector<16x1xf32>
    %cst_7 = arith.constant 1.000000e+00 : f32
    %19 = vector.broadcast %cst_7 : f32 to vector<16x1xf32>
    %20 = arith.divf %19, %18 : vector<16x1xf32>
    %21 = vector.broadcast %1 : f32 to vector<16x1xf32>
    %22 = arith.mulf %21, %20 : vector<16x1xf32>
    %23 = vector.broadcast %9 : vector<16x1xf32> to vector<16x128xf32>
    %24 = arith.subf %0, %23 : vector<16x128xf32>
    %25 = vector.broadcast %22 : vector<16x1xf32> to vector<16x128xf32>
    %26 = arith.mulf %25, %24 : vector<16x128xf32>
    %27 = vector.broadcast %2 : f32 to vector<16x128xf32>
    %28 = arith.addf %26, %27 : vector<16x128xf32>
    %c0_8 = arith.constant 0 : index
    %c0_9 = arith.constant 0 : index
    %29 = vector.load %arg3[%c0_8, %c0_9] : memref<16x128xf32, #tpu.memory_space<vmem>>, vector<16x128xf32>
    tpu.vector_store %arg3[%c0_8, %c0_9], %28 {strides = array<i32>} : memref<16x128xf32, #tpu.memory_space<vmem>>, vector<16x128xf32>,
    return
  }
  func.func @transform_0(%arg0: i32, %arg1: memref<2xf32, #tpu.memory_space<smem>>) -> (i32, i32) {
    %c0_i32 = arith.constant 0 : i32
    %c0_i32_0 = arith.constant 0 : i32
    return %arg0, %c0_i32 : i32, i32
  }
  func.func @transform_1(%arg0: i32, %arg1: memref<2xf32, #tpu.memory_space<smem>>) -> (i32, i32) {
    %c0_i32 = arith.constant 0 : i32
    %c0_i32_0 = arith.constant 0 : i32
    return %arg0, %c0_i32 : i32, i32
  }
}

</mosaic_0001>

<bundles_post_ra>
// kernel: tpu_custom_call.1
= control target key start
LH: loop header
LB: loop body
LE: loop exit
PB: predicated region body
PF: predicated region fallthrough
CT: control target
= control target key end

     0   :  { %s695_s0 = inlined_call_operand.hbm [shape: f32[2], index: 0, kind: input, shape index: {}]   ;;  %s696_s1 = inlined_call_operand.hbm [shape: f32[132,128], index: 1, kind: input, shape index: {}]   ;;  %s697_s2 = inlined_call_operand.hbm [shape: f32[132,128], index: 2, kind: output, shape index: {}]  }
   0x1   :  { %s382_s11 = scalar_lea.hbm %s695_s0, 16 }
   0x2   :  { %p383_p0 = scmp.ne.s32.totalorder %s695_s0, %s382_s11  ;;  %p386_p1 = scmp.lt.u32.totalorder %s382_s11, %s695_s0 }
   0x4   :  { %p388_p2 = pnand %p386_p1, %p383_p0 }
   0x6   :  { %391 = shalt.err (!%p388_p2)  }
   0x7   :  { %s490_s16 = smov [#allocation3]  }
   0x8   :  { %8 = dma.hbm_to_smem %s695_s0, 16, %s490_s16, [#allocation2] }
   0x9   :  { %464 = dma.done.wait [#allocation2], 16 }
   0xa   :  { %465 = vsyncadd [#allocation2], 4294967280 }
   0xb   :  { %10 = sfence }
   0xc   :  { %11 = vsyncpa [#allocation5], 0 }
   0xd   :  { %13 = vsyncpa [#allocation5 + $0x1], 0 }
   0xe   :  { %14 = vsyncpa [#allocation6], 0 }
   0xf   :  { %16 = vsyncpa [#allocation6 + $0x1], 0  ;;  %s524_s19 = smov 0   ;;  %s526_s20 = smov 0  }
  0x10   :  { %s528_s21 = smov 0   ;;  %s530_s22 = smov 0  }
  0x11 LB: > { %s545_s0 = sadd.s32 4294967295, %s488_s22   ;;  %s305_s23 = sadd.s32 4294967294, %s488_s22   ;;  %s488_s22 = sphi %s530_s22, %s705_s22   ;;  %s484_s21 = sphi %s528_s21, %s704_s21   ;;  %s480_s20 = sphi %s526_s20, %s703_s20   ;;  %s476_s19 = sphi %s524_s19, %s702_s19  }
  0x12   : > { %s549_s24 = sadd.s32 1, %s488_s22   ;;  %s29_s25 = sadd.s32 1, %s484_s21 }
  0x13   : > { %s26_s26 = ssub.s32 %s488_s22, %s549_s24  ;;  %p36_p3 = scmp.ne.s32.totalorder %s484_s21, %s480_s20 }
  0x14   : > { %p27_p4 = scmp.eq.s32.totalorder %s26_s26, 0  ;;  %p37_p5 = scmp.eq.s32.totalorder %s488_s22, 0 }
  0x15   : > { %p42_p6 = scmp.ne.s32.totalorder %s480_s20, %s476_s19  ;;  %p43_p7 = scmp.eq.s32.totalorder %s545_s0, 0 }
  0x16   : > { %s561_s27 = scalar_select %p27_p4, %s484_s21, %s29_s25  }
  0x17   : > { %p38_p8 = por %p37_p5, %p36_p3  ;;  %p563_p9 = por %p43_p7, %p42_p6 }
  0x18   : > { %p66_p10 = scmp.eq.s32.totalorder %s545_s0, 8  ;;  %p72_p11 = scmp.eq.s32.totalorder %s305_s23, 8 }
  0x19   : > { %p307_p0 = scmp.ge.s32.totalorder %s488_s22, 9 }
  0x1a   : > { %p568_p12 = por %p66_p10, %p36_p3  ;;  %p572_p13 = por %p72_p11, %p42_p6 }
  0x1b   : > { %88 = sbr.rel (%p307_p0) target bundleno = 69 (0x45), region = 16 }
  0x1c   : > { %s700_s30 = scalar_select %p572_p13, 1, 0 }
  0x22   : > { %91 = sbr.rel (!%p38_p8) target bundleno = 69 (0x45), region = 20  ;;  %s92_s3 = sand.u32 (%p38_p8), 1, %s484_s21  }
  0x23   : > { %s309_s4 = sshll.u32 (%p38_p8), %s488_s22, 1  ;;  %s308_s5 = sshll.u32 (%p38_p8), %s92_s3, 4 }
  0x24   : > { %s98_s6 = ssub.s32 (%p38_p8), 17, %s309_s4  ;;  %s582_s9 = scalar_lea.sflag (%p38_p8), [#allocation5], %s92_s3 }
  0x25   : > { %p99_p1 = scmp.lt.s32.totalorder (%p38_p8), %s98_s6, 2  ;;  %s96_s10 = scalar_lea.vmem (%p38_p8), [#allocation4], %s308_s5 }
  0x29   : > { %s707_s6 = smov (!%p99_p1, %s98_s6), 2 }
  0x2a   : > { %s579_s7 = sshll.u32 %s707_s6, 7 }
  0x2b   : > { %s103_s8 = ssub.s32 256, %s579_s7 }
  0x2c   : > { %104 = vsyncadd %s582_s9, %s103_s8  ;;  %p311_p2 = scmp.ne.s32.totalorder %s579_s7, 0  ;;  %s328_s11 = sshll.u32 %s488_s22, 8 }
  0x2d   : > { %s590_s14 = scalar_lea.hbm %s696_s1, %s328_s11  ;;  %s109_s15 = sshll.u32 %s96_s10, 4  ;;  %s592_s15 = int_to_ptr.vmem [resolvable:$true] %s109_s15 }
  0x2e   : > { %s392_s16 = scalar_lea.hbm %s590_s14, %s579_s7  ;;  %s396_s23 = scalar_lea.hbm %s696_s1, 2176 }
  0x2f   : > { %p393_p3 = scmp.ne.s32.totalorder %s590_s14, %s392_s16  ;;  %p397_p6 = scmp.lt.u32.totalorder %s590_s14, %s696_s1 }
  0x30   : > { %p398_p7 = scmp.lt.u32.totalorder %s396_s23, %s392_s16  ;;  %p400_p10 = scmp.lt.u32.totalorder %s392_s16, %s590_s14 }
  0x31   : > { %p394_p4 = pnand %p393_p3, %p311_p2 }
  0x32   : > { %p399_p8 = por %p398_p7, %p397_p6 }
  0x33   : > { %p395_p5 = pneg %p394_p4 }
  0x34   : > { %p401_p11 = por %p400_p10, %p399_p8 }
  0x36   : > { %p402_p0 = pnand %p401_p11, %p395_p5 }
  0x38   : > { %405 = shalt.err (!%p402_p0)
}
  0x39   : > { %s406_s3 = scalar_lea.vmem %s592_s15, %s579_s7  ;;  %s491_s4 = smov [#allocation4]  }
  0x3a   : > { %p407_p1 = scmp.ne.s32.totalorder %s592_s15, %s406_s3  ;;  %s410_s5 = sshll.u32 %s491_s4, 4  ;;  %s411_s5 = int_to_ptr.vmem [resolvable:$false] %s410_s5 }
  0x3b   : > { %s412_s6 = scalar_lea.vmem %s411_s5, 512  ;;  %p413_p13 = scmp.lt.s32.totalorder %s592_s15, %s411_s5 }
  0x3c   : > { %p408_p3 = pnand %p407_p1, %p311_p2  ;;  %p414_p6 = scmp.lt.s32.totalorder %s412_s6, %s406_s3 }
  0x3e   : > { %p409_p4 = pneg %p408_p3  ;;  %p415_p7 = por %p414_p6, %p413_p13 }
  0x40   : > { %p416_p8 = pnand %p415_p7, %p409_p4 }
  0x42   : > { %419 = shalt.err (!%p416_p8)
}
  0x43   : > { %s492_s8 = smov 128   ;;  %s493_s10 = smov 8  }
  0x44   : > { %115 = dma.hbm_to_vmem [thread:$0]  (%p311_p2), %s590_s14, %s579_s7, %s592_s15, %s582_s9, %s492_s8, %s492_s8, %s493_s10  }
  0x45 PF: > { %p315_p5 = scmp.ge.s32.totalorder %s488_s22, 1  ;;  %p117_p10 = scmp.lt.s32.totalorder %s488_s22, 10 }
  0x47   : > { %p118_p11 = pnand %p315_p5, %p117_p10 }
  0x48   : > { %s622_s11 = sand.u32 (!%p118_p11), 1, %s480_s20  }
  0x49   : > { %121 = sbr.rel (%p118_p11) target bundleno = 301 (0x12d), region = 24  ;;  %s316_s12 = sshll.u32 (!%p118_p11), %s622_s11, 4 }
  0x4a   : > { %s124_s13 = scalar_lea.sflag (!%p118_p11), [#allocation5], %s622_s11  ;;  %s127_s16 = scalar_lea.vmem (!%p118_p11), [#allocation4], %s316_s12 }
  0x50   : > { %467 = dma.done.wait (%p563_p9), %s124_s13, 256  }
  0x51   : > { %469 = vsyncadd (%p563_p9), %s124_s13, 4294967040  ;;  %v156_v0 = vld [vmem:[%s127_s16] sm:$0xff]  ;;  %v157_v2 = vld [vmem:[%s127_s16 + $0x8] sm:$0xff]  ;;  %s158_s28 = sld [smem:[#allocation3]]  ;;  %s318_s7 = sld [smem:[#allocation3 + $0x1]] }
  0x52   : > { %160 = vadd.xlane.f32.xlu0 %v156_v0  ;;  %v164_v1 = vmul.f32 %v156_v0, %v156_v0  ;;  %v165_v3 = vmul.f32 %v157_v2, %v157_v2  ;;  %s145_s9 = scalar_lea.vmem [#allocation7], %s316_s12  ;;  %s213_s14 = scalar_lea.sflag [#allocation6], %s622_s11 }
  0x53   : > { %s320_s15 = sshll.u32 (%p568_p12), %s545_s0, 1 }
  0x54   : > { %166 = vadd.xlane.f32.xlu1 %v164_v1  ;;  %s221_s17 = ssub.s32 (%p568_p12), 17, %s320_s15 }
  0x55   : > { %p222_p9 = scmp.lt.s32.totalorder (%p568_p12), %s221_s17, 2 }
  0x56   : > { %162 = vadd.xlane.f32.xlu0 %v157_v2 }
  0x57   : > { %v200_v30 = vstv %s158_s28  ;;  %v207_v34 = vstv %s318_s7 }
  0x58   : > { %168 = vadd.xlane.f32.xlu1 %v165_v3 }
  0xdf   : > { %v161_v4 = vpop.xlane.xlu0 %160 }
  0xe0   : > { %v170_v5 = vmul.f32 0.0078125, %v161_v4 }
  0xe1   : > { %v167_v6 = vpop.xlane.xlu1 %166 }
  0xe2   : > { %v172_v7 = vmul.f32 %v170_v5, %v161_v4  ;;  %v203_v32 = vsub.f32 %v156_v0, %v170_v5 }
  0xe3   : > { %v163_v8 = vpop.xlane.xlu0 %162 }
  0xe4   : > { %v171_v9 = vmul.f32 0.0078125, %v163_v8  ;;  %v174_v10 = vsub.f32 %v167_v6, %v172_v7 }
  0xe5   : > { %v169_v11 = vpop.xlane.xlu1 %168 }
  0xe6   : > { %v173_v12 = vmul.f32 %v171_v9, %v163_v8  ;;  %v176_v13 = vmul.f32 0.007874016, %v174_v10  ;;  %v204_v38 = vsub.f32 %v157_v2, %v171_v9 }
  0xe8   : > { %v178_v14 = vmax.f32 %v176_v13, 0.0  ;;  %v175_v15 = vsub.f32 %v169_v11, %v173_v12 }
  0xea   : > { %374 = vrsqrt.f32 %v178_v14  ;;  %v177_v16 = vmul.f32 0.007874016, %v175_v15  ;;  %vm182_vm0 = vcmp.eq.f32.partialorder %v178_v14, inf  ;;  %v185_v20 = vand.u32 2147483648, %v178_v14 }
  0xeb   : > { %vm184_vm1 = vcmp.eq.f32.partialorder %v178_v14, 0.0 }
  0xec   : > { %v179_v17 = vmax.f32 %v177_v16, 0.0 }
  0xee   : > { %376 = vrsqrt.f32 %v179_v17  ;;  %vm189_vm2 = vcmp.eq.f32.partialorder %v179_v17, inf  ;;  %v192_v26 = vand.u32 2147483648, %v179_v17  ;;  %vm191_vm3 = vcmp.eq.f32.partialorder %v179_v17, 0.0 }
  0xf4   : > { %v375_v18 = vpop.eup %374 }
  0xf5   : > { %v181_v19 = vmul.f32 %v375_v18, %v178_v14 }
  0xf7   : > { %v183_v21 = vsel %vm182_vm0, %v178_v14, %v181_v19 }
  0xf8   : > { %v186_v22 = vsel %vm184_vm1, %v185_v20, %v183_v21  ;;  %v377_v23 = vpop.eup %376 }
  0xf9   : > { %v194_v24 = vadd.f32 1e-05, %v186_v22  ;;  %v188_v25 = vmul.f32 %v377_v23, %v179_v17 }
  0xfb   : > { %378 = vrcp.f32 %v194_v24  ;;  %v190_v27 = vsel %vm189_vm2, %v179_v17, %v188_v25 }
  0xfc   : > { %v193_v28 = vsel %vm191_vm3, %v192_v26, %v190_v27 }
  0xfd   : > { %v195_v29 = vadd.f32 1e-05, %v193_v28 }
  0xff   : > { %380 = vrcp.f32 %v195_v29 }
 0x105   : > { %v379_v31 = vpop.eup %378 }
 0x106   : > { %v201_v33 = vmul.f32 %v379_v31, %v200_v30 }
 0x108   : > { %v205_v35 = vmul.f32 %v203_v32, %v201_v33 }
 0x109   : > { %v381_v36 = vpop.eup %380 }
 0x10a   : > { %v208_v37 = vadd.f32 %v207_v34, %v205_v35  ;;  %v202_v39 = vmul.f32 %v381_v36, %v200_v30  ;;  %219 = sbr.rel (!%p568_p12) target bundleno = 301 (0x12d), region = 32 }
 0x10c   : > { %210 = vst [vmem:[%s145_s9] sm:$0xff] %v208_v37  ;;  %v206_v40 = vmul.f32 %v204_v38, %v202_v39 }
 0x10e   : > { %v209_v41 = vadd.f32 %v207_v34, %v206_v40 }
 0x110   : > { %211 = vst [vmem:[%s145_s9 + $0x8] sm:$0xff] %v209_v41 }
 0x111   : > { %s709_s17 = smov (!%p222_p9, %s221_s17), 2 }
 0x112   : > { %s638_s18 = sshll.u32 %s709_s17, 7 }
 0x113   : > { %s226_s23 = ssub.s32 256, %s638_s18 }
 0x114   : > { %227 = vsyncadd %s213_s14, %s226_s23  ;;  %p322_p13 = scmp.ne.s32.totalorder %s638_s18, 0  ;;  %s329_s25 = sshll.u32 %s545_s0, 8 }
 0x115   : > { %s648_s3 = scalar_lea.hbm %s697_s2, %s329_s25  ;;  %s232_s4 = sshll.u32 %s145_s9, 4  ;;  %s650_s4 = int_to_ptr.vmem [resolvable:$true] %s232_s4 }
 0x116   : > { %s420_s5 = scalar_lea.vmem %s650_s4, %s638_s18  ;;  %s494_s6 = smov [#allocation7]  }
 0x117   : > { %p421_p12 = scmp.ne.s32.totalorder %s650_s4, %s420_s5  ;;  %s424_s8 = sshll.u32 %s494_s6, 4  ;;  %s425_s8 = int_to_ptr.vmem [resolvable:$false] %s424_s8 }
 0x118   : > { %s426_s0 = scalar_lea.vmem %s425_s8, 512  ;;  %p427_p1 = scmp.lt.s32.totalorder %s650_s4, %s425_s8 }
 0x119   : > { %p422_p2 = pnand %p421_p12, %p322_p13  ;;  %p428_p3 = scmp.lt.s32.totalorder %s426_s0, %s420_s5 }
 0x11b   : > { %p423_p0 = pneg %p422_p2  ;;  %p429_p4 = por %p428_p3, %p427_p1 }
 0x11d   : > { %p430_p6 = pnand %p429_p4, %p423_p0 }
 0x11f   : > { %433 = shalt.err (!%p430_p6)
}
 0x120   : > { %s434_s10 = scalar_lea.hbm %s648_s3, %s638_s18  ;;  %s438_s16 = scalar_lea.hbm %s697_s2, 2176 }
 0x121   : > { %p435_p7 = scmp.ne.s32.totalorder %s648_s3, %s434_s10  ;;  %p439_p10 = scmp.lt.u32.totalorder %s648_s3, %s697_s2 }
 0x122   : > { %p440_p11 = scmp.lt.u32.totalorder %s438_s16, %s434_s10  ;;  %p442_p12 = scmp.lt.u32.totalorder %s434_s10, %s648_s3 }
 0x123   : > { %p436_p8 = pnand %p435_p7, %p322_p13 }
 0x124   : > { %p441_p9 = por %p440_p11, %p439_p10 }
 0x125   : > { %p437_p5 = pneg %p436_p8 }
 0x126   : > { %p443_p2 = por %p442_p12, %p441_p9 }
 0x128   : > { %p444_p0 = pnand %p443_p2, %p437_p5 }
 0x12a   : > { %447 = shalt.err (!%p444_p0)
}
 0x12b   : > { %s495_s9 = smov 128   ;;  %s496_s15 = smov 8  }
 0x12c   : > { %238 = dma.vmem_to_hbm [thread:$0]  (%p322_p13), %s650_s4, %s638_s18, %s648_s3, %s213_s14, %s495_s9, %s495_s9, %s496_s15  }
 0x12d PF: > { %p336_p1 = scmp.ge.s32.totalorder %s488_s22, 2  ;;  %s247_s17 = sand.u32 1, %s476_s19  }
 0x12e   : > { %p701_p3 = scmp.ne.s32.totalorder %s700_s30, 0  ;;  %s248_s23 = scalar_lea.sflag [#allocation6], %s247_s17 }
 0x130   : > { %p333_p4 = pnand %p336_p1, %p701_p3 }
 0x132   : > { %471 = dma.done.wait (!%p333_p4), %s248_s23, 256  }
 0x133   : > { %473 = vsyncadd (!%p333_p4), %s248_s23, 4294967040  ;;  %p19_p6 = scmp.ge.s32.totalorder %s549_s24, 11   ;;  %s702_s19 = smov %s480_s20 }
 0x134   : > { %s703_s20 = smov %s484_s21  ;;  %s704_s21 = smov %s561_s27 }
 0x135   : > { %s705_s22 = smov %s549_s24  ;;  %21 = sbr.rel (!%p19_p6) target bundleno = 17 (0x11), region = 69 }
 0x13c   :  { %253 = vsyncpa [#allocation5], 1 }
 0x13d   :  { %255 = vsyncpa [#allocation5 + $0x1], 1 }
 0x13e   :  { %256 = vsyncpa [#allocation6], 1 }
 0x13f   :  { %258 = vsyncpa [#allocation6 + $0x1], 1 }

</bundles_post_ra>
